<compile_context>
chip_gen: v7x
topology: tpu7x:2x2x1
jax: 0.10.0
libtpu: 0.0.40
codegen_flags: <defaults>
</compile_context>

<pallas_src>
import functools

import jax
import jax.numpy as jnp
from jax.experimental import pallas as pl
from jax.experimental.pallas import tpu as pltpu

# ---------------------------------------------------------------- config ----
BATCH = 2
CHANNELS = 32
IMG = 16
K_SIZE = 3


# ------------------------------------------------------------- Pallas kernel

def _eca_kernel(x_ref, w_ref, o_ref, *, k_size):
    # x_ref: (B, C, H*W) activations (native dtype), VMEM
    # w_ref: (k,) conv taps, already scaled by 1/(H*W), SMEM scalars
    # o_ref: (B, C, H*W), VMEM
    x = x_ref[...]
    B, C, _ = x_ref.shape
    pad = (k_size - 1) // 2

    # AdaptiveAvgPool2d(1): per-(b, c) spatial reduction over the lane axis.
    # 1/(H*W) is folded into the taps, so this is a plain sum; C stays on sublanes.
    y = jnp.sum(x, axis=-1, keepdims=True).astype(jnp.float32)          # (B, C, 1)

    # Conv1d(1, 1, k, padding=(k-1)//2, bias=False) along the channel (sublane) axis:
    #   acc[c] = sum_j w[j] * y[c + j - pad], zero-padded at the channel boundaries.
    c_idx = jax.lax.broadcasted_iota(jnp.int32, (B, C, 1), 1)
    acc = jnp.zeros_like(y)
    for j in range(k_size):
        off = j - pad
        if off == 0:
            tap = y
        else:
            # tap[c] = y[(c + off) mod C]  (XLU sublane rotate), then zero the wrapped rows.
            tap = pltpu.roll(y, (-off) % C, 1)
            tap = jnp.where((c_idx + off >= 0) & (c_idx + off < C), tap, 0.0)
        acc = acc + w_ref[j] * tap

    # Sigmoid gate (exp on the EUP), then channel re-weighting broadcast over lanes.
    a = 1.0 / (1.0 + jnp.exp(-acc))                                     # (B, C, 1) f32
    o_ref[...] = x * a.astype(x.dtype)


def _eca_forward_impl(x_nchw, conv_w):
    B, C, H, W = x_nchw.shape
    x3 = x_nchw.reshape(B, C, H * W)                       # lane-dense layout, free reshape
    # Fold the average-pool's 1/(H*W) into the conv taps (traced, jit-friendly, ~free).
    w = (conv_w.reshape(-1) * (1.0 / (H * W))).astype(jnp.float32)
    k = int(w.shape[0])

    itemsize = jnp.dtype(x_nchw.dtype).itemsize
    cost = pl.CostEstimate(
        flops=2 * B * C * H * W + 2 * k * B * C,
        transcendentals=B * C,
        bytes_accessed=2 * B * C * H * W * itemsize + k * 4,
    )

    out = pl.pallas_call(
        functools.partial(_eca_kernel, k_size=k),
        out_shape=jax.ShapeDtypeStruct((B, C, H * W), x_nchw.dtype),
        in_specs=[
            pl.BlockSpec(memory_space=pltpu.MemorySpace.VMEM),   # whole activation block
            pl.BlockSpec(memory_space=pltpu.MemorySpace.SMEM),   # (k,) conv taps as scalars
        ],
        out_specs=pl.BlockSpec(memory_space=pltpu.MemorySpace.VMEM),
        cost_estimate=cost,
    )(x3, w)
    return out.reshape(B, C, H, W)


# jit the whole forward (now possible: no host-side weight re-layout).
eca_forward = jax.jit(_eca_forward_impl)


# ----------------------------------------------------------- pure-JAX reference

def _eca_reference(x, conv_w):
    B, C, H, W = x.shape
    k = conv_w.shape[0]
    pad = (k - 1) // 2
    y = jnp.mean(x, axis=(2, 3))                                  # (B, C)
    yp = jnp.pad(y, ((0, 0), (pad, pad)))
    yc = sum(conv_w[j] * yp[:, j:j + C] for j in range(k))
    a = 1.0 / (1.0 + jnp.exp(-yc))
    return x * a[:, :, None, None]


# ----------------------------------------------------------------------- main

if __name__ == "__main__":
    key = jax.random.PRNGKey(0)
    kx, kw = jax.random.split(key)
    x = jax.random.normal(kx, (BATCH, CHANNELS, IMG, IMG), jnp.float32)
    conv_w = 0.5 * jax.random.normal(kw, (K_SIZE,), jnp.float32)  # Conv1d(1,1,3,bias=False).weight

    out = jax.block_until_ready(eca_forward(x, conv_w))

    assert out.shape == (BATCH, CHANNELS, IMG, IMG), out.shape
    assert bool(jnp.all(jnp.isfinite(out)))

    ref = _eca_reference(x, conv_w)
    assert bool(jnp.allclose(out, ref, atol=1e-4, rtol=1e-4)), \
        float(jnp.max(jnp.abs(out - ref)))

    print("KERNEL_OK")
</pallas_src>

<mosaic_0001>
module attributes {stable_mosaic.version = 11 : i64} {
  func.func @_eca_kernel(%arg0: memref<2x32x256xf32, #tpu.memory_space<vmem>>, %arg1: memref<3xf32, #tpu.memory_space<smem>>, %arg2: memref<2x32x256xf32, #tpu.memory_space<vmem>>) attributes {dimension_semantics = [], scalar_prefetch = 0 : i64, scratch_operands = 0 : i64, tpu.core_type = #tpu.core_type<tc>} {
    %c0 = arith.constant 0 : index
    %c0_0 = arith.constant 0 : index
    %c0_1 = arith.constant 0 : index
    %0 = vector.load %arg0[%c0, %c0_0, %c0_1] : memref<2x32x256xf32, #tpu.memory_space<vmem>>, vector<2x32x256xf32>
    %cst = arith.constant dense<0.000000e+00> : vector<2x32xf32>
    %1 = vector.multi_reduction <add>, %0, %cst [2] : vector<2x32x256xf32> to vector<2x32xf32>
    %2 = vector.shape_cast %1 : vector<2x32xf32> to vector<2x32x1xf32>
    %3 = tpu.iota {dimensions = array<i32: 1>} : vector<2x32x1xi32>
    %cst_2 = arith.constant 0.000000e+00 : f32
    %4 = vector.broadcast %cst_2 : f32 to vector<2x32x1xf32>
    %c1_i32 = arith.constant 1 : i32
    %5 = tpu.dynamic_rotate %2 by %c1_i32 dim 1 : vector<2x32x1xf32>, i32 -> vector<2x32x1xf32>
    %c-1_i32 = arith.constant -1 : i32
    %6 = vector.broadcast %c-1_i32 : i32 to vector<2x32x1xi32>
    %7 = arith.addi %3, %6 : vector<2x32x1xi32>
    %c0_i32 = arith.constant 0 : i32
    %8 = vector.broadcast %c0_i32 : i32 to vector<2x32x1xi32>
    %9 = arith.cmpi sge, %7, %8 : vector<2x32x1xi32>
    %c-1_i32_3 = arith.constant -1 : i32
    %10 = vector.broadcast %c-1_i32_3 : i32 to vector<2x32x1xi32>
    %11 = arith.addi %3, %10 : vector<2x32x1xi32>
    %c32_i32 = arith.constant 32 : i32
    %12 = vector.broadcast %c32_i32 : i32 to vector<2x32x1xi32>
    %13 = arith.cmpi slt, %11, %12 : vector<2x32x1xi32>
    %14 = arith.andi %9, %13 : vector<2x32x1xi1>
    %cst_4 = arith.constant 0.000000e+00 : f32
    %15 = vector.broadcast %cst_4 : f32 to vector<2x32x1xf32>
    %16 = arith.select %14, %5, %15 : vector<2x32x1xi1>, vector<2x32x1xf32>
    %c0_5 = arith.constant 0 : index
    %17 = memref.load %arg1[%c0_5] : memref<3xf32, #tpu.memory_space<smem>>
    %18 = vector.broadcast %17 : f32 to vector<2x32x1xf32>
    %19 = arith.mulf %18, %16 : vector<2x32x1xf32>
    %20 = arith.addf %4, %19 : vector<2x32x1xf32>
    %c1 = arith.constant 1 : index
    %21 = memref.load %arg1[%c1] : memref<3xf32, #tpu.memory_space<smem>>
    %22 = vector.broadcast %21 : f32 to vector<2x32x1xf32>
    %23 = arith.mulf %22, %2 : vector<2x32x1xf32>
    %24 = arith.addf %20, %23 : vector<2x32x1xf32>
    %c31_i32 = arith.constant 31 : i32
    %25 = tpu.dynamic_rotate %2 by %c31_i32 dim 1 : vector<2x32x1xf32>, i32 -> vector<2x32x1xf32>
    %c1_i32_6 = arith.constant 1 : i32
    %26 = vector.broadcast %c1_i32_6 : i32 to vector<2x32x1xi32>
    %27 = arith.addi %3, %26 : vector<2x32x1xi32>
    %c0_i32_7 = arith.constant 0 : i32
    %28 = vector.broadcast %c0_i32_7 : i32 to vector<2x32x1xi32>
    %29 = arith.cmpi sge, %27, %28 : vector<2x32x1xi32>
    %c1_i32_8 = arith.constant 1 : i32
    %30 = vector.broadcast %c1_i32_8 : i32 to vector<2x32x1xi32>
    %31 = arith.addi %3, %30 : vector<2x32x1xi32>
    %c32_i32_9 = arith.constant 32 : i32
    %32 = vector.broadcast %c32_i32_9 : i32 to vector<2x32x1xi32>
    %33 = arith.cmpi slt, %31, %32 : vector<2x32x1xi32>
    %34 = arith.andi %29, %33 : vector<2x32x1xi1>
    %cst_10 = arith.constant 0.000000e+00 : f32
    %35 = vector.broadcast %cst_10 : f32 to vector<2x32x1xf32>
    %36 = arith.select %34, %25, %35 : vector<2x32x1xi1>, vector<2x32x1xf32>
    %c2 = arith.constant 2 : index
    %37 = memref.load %arg1[%c2] : memref<3xf32, #tpu.memory_space<smem>>
    %38 = vector.broadcast %37 : f32 to vector<2x32x1xf32>
    %39 = arith.mulf %38, %36 : vector<2x32x1xf32>
    %40 = arith.addf %24, %39 : vector<2x32x1xf32>
    %cst_11 = arith.constant 0.000000e+00 : f32
    %41 = vector.broadcast %cst_11 : f32 to vector<2x32x1xf32>
    %42 = arith.subf %41, %40 : vector<2x32x1xf32>
    %43 = math.exp %42 : vector<2x32x1xf32>
    %cst_12 = arith.constant 1.000000e+00 : f32
    %44 = vector.broadcast %cst_12 : f32 to vector<2x32x1xf32>
    %45 = arith.addf %44, %43 : vector<2x32x1xf32>
    %cst_13 = arith.constant 1.000000e+00 : f32
    %46 = vector.broadcast %cst_13 : f32 to vector<2x32x1xf32>
    %47 = arith.divf %46, %45 : vector<2x32x1xf32>
    %48 = vector.broadcast %47 : vector<2x32x1xf32> to vector<2x32x256xf32>
    %49 = arith.mulf %0, %48 : vector<2x32x256xf32>
    %c0_14 = arith.constant 0 : index
    %c0_15 = arith.constant 0 : index
    %c0_16 = arith.constant 0 : index
    %50 = vector.load %arg2[%c0_14, %c0_15, %c0_16] : memref<2x32x256xf32, #tpu.memory_space<vmem>>, vector<2x32x256xf32>
    tpu.vector_store %arg2[%c0_14, %c0_15, %c0_16], %49 {strides = array<i32>} : memref<2x32x256xf32, #tpu.memory_space<vmem>>, vector<2x32x256xf32>,
    return
  }
}

</mosaic_0001>

<bundles_post_ra>
// kernel: _eca_forward_impl.1
= control target key start
LH: loop header
LB: loop body
LE: loop exit
PB: predicated region body
PF: predicated region fallthrough
CT: control target
= control target key end

     0   :  { %7 = vsyncpa [#allocation3], 0  ;;  %s657_s0 = inlined_call_operand.vmem [shape: f32[2,32,256], index: 0, kind: input, shape index: {}]   ;;  %s658_s1 = inlined_call_operand.vmem [shape: f32[3], index: 1, kind: input, shape index: {}]   ;;  %s659_s2 = inlined_call_operand.vmem [shape: f32[2,32,256], index: 2, kind: output, shape index: {}]  }
   0x1   :  { %s16_s11 = sshll.u32 %s658_s1, 4  ;;  %s17_s11 = int_to_ptr.vmem [resolvable:$true] %s16_s11 }
   0x2   :  { %s368_s12 = scalar_lea.vmem %s17_s11, 16  ;;  %p373_p1 = scmp.lt.s32.totalorder %s17_s11, %s17_s11 }
   0x3   :  { %p369_p0 = scmp.ne.s32.totalorder %s17_s11, %s368_s12  ;;  %p374_p2 = scmp.lt.s32.totalorder %s368_s12, %s368_s12 }
   0x5   :  { %p375_p3 = por %p374_p2, %p373_p1 }
   0x7   :  { %p376_p4 = pnand %p375_p3, %p369_p0 }
   0x9   :  { %379 = shalt.err (!%p376_p4)
}
   0xa   :  { %s382_s13 = smov [#allocation2]  }
   0xb   :  { %19 = dma.vmem_to_smem %s17_s11, 16, %s382_s13, [#allocation3]  }
   0xc   :  { %380 = dma.done.wait [#allocation3], 16  }
   0xd   :  { %381 = vsyncadd [#allocation3], 4294967280 }
   0xe   :  { %23 = sfence }
   0xf   :  { %v405_v0 = vld [vmem:[%s657_s0 + $0x40] sm:$0xff]  ;;  %v410_v1 = vld [vmem:[%s657_s0 + $0x48] sm:$0xff]  ;;  %v427_v5 = vld [vmem:[%s657_s0 + $0x70] sm:$0xff]  ;;  %v383_v24 = vmov 0   ;;  %v64_v25 = vlaneseq  ;;  %s110_s1 = sld [smem:[#allocation2]]  ;;  %s331_s17 = sld [smem:[#allocation2 + $0x2]] }
  0x10   :  { %v415_v2 = vld [vmem:[%s657_s0] sm:$0xff]  ;;  %v52_v3 = vadd.f32 %v410_v1, %v405_v0  ;;  %v422_v4 = vld [vmem:[%s657_s0 + $0x8] sm:$0xff]  ;;  %v432_v6 = vld [vmem:[%s657_s0 + $0x78] sm:$0xff]  ;;  %334 = vset.pattern.permute.xlu0 %v383_v24  ;;  %335 = vset.pattern.permute.xlu1 %v383_v24 }
  0x11   :  { %v40_v7 = vadd.f32 %v422_v4, %v415_v2  ;;  %v439_v8 = vld [vmem:[%s657_s0 + $0x30] sm:$0xff]  ;;  %v444_v9 = vld [vmem:[%s657_s0 + $0x38] sm:$0xff]  ;;  %v61_v10 = vadd.f32 %v432_v6, %v427_v5  ;;  %v453_v12 = vld [vmem:[%s657_s0 + $0x20] sm:$0xff]  ;;  %v498_v26 = vshrl.u32 %v64_v25, 7 }
  0x12   :  { %53 = vadd.xlane.f32.xlu1 %v52_v3  ;;  %v49_v11 = vadd.f32 %v444_v9, %v439_v8  ;;  %v458_v13 = vld [vmem:[%s657_s0 + $0x28] sm:$0xff]  ;;  %v463_v14 = vld [vmem:[%s657_s0 + $0x10] sm:$0xff]  ;;  %v468_v15 = vld [vmem:[%s657_s0 + $0x18] sm:$0xff] }
  0x13   :  { %41 = vadd.xlane.f32.xlu0 %v40_v7  ;;  %v46_v16 = vadd.f32 %v458_v13, %v453_v12  ;;  %v43_v17 = vadd.f32 %v468_v15, %v463_v14  ;;  %v477_v18 = vld [vmem:[%s657_s0 + $0x60] sm:$0xff]  ;;  %v482_v19 = vld [vmem:[%s657_s0 + $0x68] sm:$0xff]  ;;  %v487_v20 = vld [vmem:[%s657_s0 + $0x50] sm:$0xff]  ;;  %v68_v27 = vadd.s32 24, %v498_v26  ;;  %v504_v30 = vadd.s32 4294967295, %v498_v26 }
  0x14   :  { %v492_v21 = vld [vmem:[%s657_s0 + $0x58] sm:$0xff]  ;;  %v58_v22 = vadd.f32 %v482_v19, %v477_v18  ;;  %s330_s0 = sld [smem:[#allocation2 + $0x1]]  ;;  %vm77_vm0 = vcmp.lt.s32.totalorder %v498_v26, 1  ;;  %vm154_vm2 = vcmp.lt.s32.totalorder %v498_v26, 7 }
  0x15   :  { %v55_v23 = vadd.f32 %v492_v21, %v487_v20  ;;  %v506_v31 = vadd.s32 1, %v68_v27  ;;  %vm90_vm1 = vcmp.ge.s32.totalorder %v504_v30, 0  ;;  %v516_v39 = vstv %s110_s1 }
  0x16   :  { %62 = vadd.xlane.f32.xlu1 %v61_v10  ;;  %v519_v41 = vstv %s331_s17 }
  0x17   :  { %50 = vadd.xlane.f32.xlu0 %v49_v11  ;;  %vm174_vm3 = vcmp.lt.s32.totalorder %v506_v31, 32 }
  0x1a   :  { %47 = vadd.xlane.f32.xlu1 %v46_v16  ;;  %v514_v38 = vstv %s330_s0 }
  0x1b   :  { %44 = vadd.xlane.f32.xlu0 %v43_v17 }
  0x1e   :  { %59 = vadd.xlane.f32.xlu1 %v58_v22 }
  0x1f   :  { %56 = vadd.xlane.f32.xlu0 %v55_v23 }
  0x9f   :  { %v501_v28 = vpop.xlane.xlu1 %53 }
  0xa0   :  { %v42_v29 = vpop.xlane.xlu0 %41  ;;  %v70_v45 = vrot.slane %v501_v28, 7  ;;  %v528_v46 = vmul.f32 %v514_v38, %v501_v28 }
  0xa1   :  { %v69_v34 = vrot.slane %v42_v29, 7  ;;  %v146_v35 = vrot.slane %v42_v29, 1  ;;  %v130_v50 = vmul.f32 %v514_v38, %v42_v29 }
  0xa3   :  { %v508_v32 = vpop.xlane.xlu1 %62 }
  0xa4   :  { %v51_v33 = vpop.xlane.xlu0 %50  ;;  %v76_v40 = vrot.slane %v508_v32, 7 }
  0xa5   :  { %v75_v36 = vrot.slane %v51_v33, 7  ;;  %v152_v37 = vrot.slane %v51_v33, 1  ;;  %v133_v52 = vmul.f32 %v514_v38, %v51_v33 }
  0xa6   :  { %v85_v54 = vsel %vm77_vm0, %v76_v40, %v70_v45 }
  0xa7   :  { %v84_v42 = vsel %vm77_vm0, %v75_v36, %v69_v34  ;;  %v161_v43 = vsel %vm154_vm2, %v152_v37, %v146_v35  ;;  %v48_v44 = vpop.xlane.xlu1 %47 }
  0xa8   :  { %v102_v47 = vsel %vm90_vm1, %v84_v42, 0.0  ;;  %v182_v48 = vsel %vm174_vm3, %v161_v43, 0.0  ;;  %v45_v49 = vpop.xlane.xlu0 %44  ;;  %v73_v53 = vrot.slane %v48_v44, 7  ;;  %v150_v56 = vrot.slane %v48_v44, 1 }
  0xa9   :  { %v112_v51 = vmul.f32 %v516_v39, %v102_v47  ;;  %v192_v55 = vmul.f32 %v519_v41, %v182_v48  ;;  %v71_v57 = vrot.slane %v45_v49, 7  ;;  %v132_v59 = vmul.f32 %v514_v38, %v48_v44 }
  0xaa   :  { %v78_v58 = vsel %vm77_vm0, %v73_v53, %v75_v36  ;;  %v131_v60 = vmul.f32 %v514_v38, %v45_v49  ;;  %v148_v61 = vrot.slane %v45_v49, 1  ;;  %v155_v3 = vsel %vm154_vm2, %v150_v56, %v152_v37 }
  0xab   :  { %v60_v62 = vpop.xlane.xlu1 %59  ;;  %v115_v63 = vmul.f32 %v516_v39, %v78_v58  ;;  %v80_v7 = vsel %vm77_vm0, %v71_v57, %v73_v53  ;;  %v82_v10 = vsel %vm77_vm0, %v69_v34, %v71_v57  ;;  %v138_v11 = vadd.f32 %v130_v50, %v112_v51 }
  0xac   :  { %v113_v16 = vmul.f32 %v516_v39, %v82_v10  ;;  %v114_v17 = vmul.f32 %v516_v39, %v80_v7  ;;  %v157_v22 = vsel %vm154_vm2, %v148_v61, %v150_v56  ;;  %v57_v23 = vpop.xlane.xlu0 %56  ;;  %v191_v25 = vmul.f32 %v519_v41, %v155_v3 }
  0xad   :  { %v141_v24 = vadd.f32 %v133_v52, %v115_v63  ;;  %v159_v27 = vsel %vm154_vm2, %v146_v35, %v148_v61  ;;  %v74_v29 = vrot.slane %v60_v62, 7  ;;  %v190_v37 = vmul.f32 %v519_v41, %v157_v22 }
  0xae   :  { %v139_v33 = vadd.f32 %v131_v60, %v113_v16  ;;  %v140_v36 = vadd.f32 %v132_v59, %v114_v17  ;;  %v189_v34 = vmul.f32 %v519_v41, %v159_v27  ;;  %v147_v42 = vrot.slane %v501_v28, 1 }
  0xaf   :  { %v200_v43 = vadd.f32 %v192_v55, %v141_v24  ;;  %v151_v44 = vrot.slane %v60_v62, 1  ;;  %v72_v47 = vrot.slane %v57_v23, 7  ;;  %v153_v48 = vrot.slane %v508_v32, 1 }
  0xb0   :  { %v197_v49 = vadd.f32 %v189_v34, %v138_v11  ;;  %v198_v50 = vadd.f32 %v190_v37, %v139_v33  ;;  %v199_v51 = vadd.f32 %v191_v25, %v140_v36  ;;  %v106_v35 = vsel %vm90_vm1, %v85_v54, 0.0 }
  0xb1   :  { %v136_v52 = vmul.f32 %v514_v38, %v60_v62  ;;  %v81_v53 = vsel %vm77_vm0, %v72_v47, %v74_v29  ;;  %v83_v56 = vsel %vm77_vm0, %v70_v45, %v72_v47  ;;  %v208_v28 = vsub.f32 0.0, %v200_v43 }
  0xb2   :  { %v205_v55 = vsub.f32 0.0, %v197_v49  ;;  %v206_v57 = vsub.f32 0.0, %v198_v50  ;;  %v207_v58 = vsub.f32 0.0, %v199_v51  ;;  %v79_v59 = vsel %vm77_vm0, %v74_v29, %v76_v40 }
  0xb3   :  { %v156_v60 = vsel %vm154_vm2, %v151_v44, %v153_v48  ;;  %v117_v30 = vmul.f32 %v516_v39, %v83_v56  ;;  %v118_v54 = vmul.f32 %v516_v39, %v81_v53  ;;  %v162_v61 = vsel %vm154_vm2, %v153_v48, %v147_v42 }
  0xb4   :  { %v213_v62 = vmul.f32 1.442695, %v205_v55  ;;  %v215_v63 = vmul.f32 1.442695, %v206_v57  ;;  %v217_v45 = vmul.f32 1.442695, %v207_v58  ;;  %v116_v3 = vmul.f32 %v516_v39, %v106_v35 }
  0xb5   :  { %v135_v7 = vmul.f32 %v514_v38, %v57_v23  ;;  %v144_v10 = vadd.f32 %v136_v52, %v118_v54  ;;  %v149_v11 = vrot.slane %v57_v23, 1  ;;  %v219_v40 = vmul.f32 1.442695, %v208_v28 }
  0xb6   :  { %336 = vpow2.f32 %v213_v62  ;;  %v119_v16 = vmul.f32 %v516_v39, %v79_v59  ;;  %v195_v17 = vmul.f32 %v519_v41, %v156_v60  ;;  %v137_v23 = vmul.f32 %v514_v38, %v508_v32 }
  0xb7   :  { %338 = vpow2.f32 %v215_v63  ;;  %v143_v22 = vadd.f32 %v135_v7, %v117_v30  ;;  %v158_v24 = vsel %vm154_vm2, %v149_v11, %v151_v44  ;;  %v160_v25 = vsel %vm154_vm2, %v147_v42, %v149_v11 }
  0xb8   :  { %340 = vpow2.f32 %v217_v45  ;;  %v193_v27 = vmul.f32 %v519_v41, %v160_v25  ;;  %v194_v29 = vmul.f32 %v519_v41, %v158_v24  ;;  %v142_v39 = vadd.f32 %v528_v46, %v116_v3 }
  0xb9   :  { %v203_v33 = vadd.f32 %v195_v17, %v144_v10  ;;  %v186_v36 = vsel %vm174_vm3, %v162_v61, 0.0  ;;  %342 = vpow2.f32 %v219_v40  ;;  %v145_v37 = vadd.f32 %v137_v23, %v119_v16 }
  0xba   :  { %v202_v34 = vadd.f32 %v194_v29, %v143_v22  ;;  %v201_v43 = vadd.f32 %v193_v27, %v142_v39  ;;  %v196_v44 = vmul.f32 %v519_v41, %v186_v36 }
  0xbb   :  { %v211_v26 = vsub.f32 0.0, %v203_v33 }
  0xbc   :  { %v210_v42 = vsub.f32 0.0, %v202_v34  ;;  %v204_v49 = vadd.f32 %v196_v44, %v145_v37  ;;  %v209_v50 = vsub.f32 0.0, %v201_v43 }
  0xbd   :  { %v225_v48 = vmul.f32 1.442695, %v211_v26 }
  0xbe   :  { %v223_v47 = vmul.f32 1.442695, %v210_v42  ;;  %v212_v31 = vsub.f32 0.0, %v204_v49  ;;  %v221_v52 = vmul.f32 1.442695, %v209_v50 }
  0xc0   :  { %v337_v51 = vpop.eup %336  ;;  %344 = vpow2.f32 %v223_v47  ;;  %v227_v28 = vmul.f32 1.442695, %v212_v31 }
  0xc1   :  { %v339_v32 = vpop.eup %338  ;;  %v229_v38 = vadd.f32 1.0, %v337_v51  ;;  %346 = vpow2.f32 %v225_v48 }
  0xc2   :  { %v341_v46 = vpop.eup %340  ;;  %v230_v35 = vadd.f32 1.0, %v339_v32 }
  0xc3   :  { %348 = vrcp.f32 %v229_v38  ;;  %v231_v53 = vadd.f32 1.0, %v341_v46  ;;  %v343_v56 = vpop.eup %342 }
  0xc4   :  { %350 = vrcp.f32 %v230_v35  ;;  %v232_v41 = vadd.f32 1.0, %v343_v56 }
  0xc5   :  { %352 = vpow2.f32 %v221_v52 }
  0xc6   :  { %354 = vrcp.f32 %v231_v53 }
  0xc7   :  { %356 = vpow2.f32 %v227_v28 }
  0xc8   :  { %358 = vrcp.f32 %v232_v41 }
  0xca   :  { %v345_v55 = vpop.eup %344 }
  0xcb   :  { %v347_v57 = vpop.eup %346  ;;  %v234_v58 = vadd.f32 1.0, %v345_v55 }
  0xcc   :  { %v235_v30 = vadd.f32 1.0, %v347_v57 }
  0xcd   :  { %v349_v59 = vpop.eup %348  ;;  %360 = vrcp.f32 %v234_v58 }
  0xce   :  { %v351_v60 = vpop.eup %350  ;;  %255 = vperm.xlu0 %334, %v349_v59   ;;  %362 = vrcp.f32 %v235_v30 }
  0xcf   :  { %260 = vperm.xlu1 %335, %v351_v60   ;;  %v353_v54 = vpop.eup %352 }
  0xd0   :  { %v355_v61 = vpop.eup %354  ;;  %v233_v62 = vadd.f32 1.0, %v353_v54 }
  0xd1   :  { %v357_v63 = vpop.eup %356 }
  0xd2   :  { %v359_v45 = vpop.eup %358  ;;  %v236_v3 = vadd.f32 1.0, %v357_v63  ;;  %364 = vrcp.f32 %v233_v62 }
  0xd3   :  { %265 = vperm.xlu1 %335, %v355_v61  }
  0xd4   :  { %366 = vrcp.f32 %v236_v3 }
  0xd7   :  { %270 = vperm.xlu1 %335, %v359_v45   ;;  %v361_v7 = vpop.eup %360 }
  0xd8   :  { %v363_v10 = vpop.eup %362 }
  0xdb   :  { %280 = vperm.xlu1 %335, %v361_v7  }
  0xdc   :  { %v365_v11 = vpop.eup %364 }
  0xde   :  { %v367_v40 = vpop.eup %366 }
  0xdf   :  { %285 = vperm.xlu1 %335, %v363_v10  }
  0xe3   :  { %275 = vperm.xlu1 %335, %v365_v11  }
  0xe7   :  { %290 = vperm.xlu1 %335, %v367_v40  }
 0x14d   :  { %v256_v16 = vpop.permute.xlu0 %255 }
 0x14e   :  { %v293_v17 = vmul.f32 %v256_v16, %v415_v2  ;;  %v294_v22 = vmul.f32 %v256_v16, %v422_v4  ;;  %v261_v24 = vpop.permute.xlu1 %260 }
 0x14f   :  { %v295_v25 = vmul.f32 %v261_v24, %v463_v14  ;;  %v296_v27 = vmul.f32 %v261_v24, %v468_v15 }
 0x150   :  { %309 = vst [vmem:[%s659_s2] sm:$0xff] %v293_v17  ;;  %310 = vst [vmem:[%s659_s2 + $0x8] sm:$0xff] %v294_v22 }
 0x151   :  { %311 = vst [vmem:[%s659_s2 + $0x10] sm:$0xff] %v295_v25  ;;  %312 = vst [vmem:[%s659_s2 + $0x18] sm:$0xff] %v296_v27 }
 0x152   :  { %v266_v2 = vpop.permute.xlu1 %265 }
 0x153   :  { %v297_v4 = vmul.f32 %v266_v2, %v453_v12  ;;  %v298_v14 = vmul.f32 %v266_v2, %v458_v13 }
 0x155   :  { %313 = vst [vmem:[%s659_s2 + $0x20] sm:$0xff] %v297_v4  ;;  %314 = vst [vmem:[%s659_s2 + $0x28] sm:$0xff] %v298_v14 }
 0x156   :  { %v271_v15 = vpop.permute.xlu1 %270 }
 0x157   :  { %v299_v29 = vmul.f32 %v271_v15, %v439_v8  ;;  %v300_v23 = vmul.f32 %v271_v15, %v444_v9 }
 0x159   :  { %315 = vst [vmem:[%s659_s2 + $0x30] sm:$0xff] %v299_v29  ;;  %316 = vst [vmem:[%s659_s2 + $0x38] sm:$0xff] %v300_v23 }
 0x15a   :  { %v281_v12 = vpop.permute.xlu1 %280 }
 0x15b   :  { %v303_v13 = vmul.f32 %v281_v12, %v487_v20  ;;  %v304_v39 = vmul.f32 %v281_v12, %v492_v21 }
 0x15d   :  { %319 = vst [vmem:[%s659_s2 + $0x50] sm:$0xff] %v303_v13  ;;  %320 = vst [vmem:[%s659_s2 + $0x58] sm:$0xff] %v304_v39 }
 0x15e   :  { %v286_v8 = vpop.permute.xlu1 %285 }
 0x15f   :  { %v305_v9 = vmul.f32 %v286_v8, %v477_v18  ;;  %v306_v33 = vmul.f32 %v286_v8, %v482_v19 }
 0x161   :  { %321 = vst [vmem:[%s659_s2 + $0x60] sm:$0xff] %v305_v9  ;;  %322 = vst [vmem:[%s659_s2 + $0x68] sm:$0xff] %v306_v33 }
 0x162   :  { %v276_v20 = vpop.permute.xlu1 %275 }
 0x163   :  { %v301_v21 = vmul.f32 %v276_v20, %v405_v0  ;;  %v302_v36 = vmul.f32 %v276_v20, %v410_v1 }
 0x165   :  { %317 = vst [vmem:[%s659_s2 + $0x40] sm:$0xff] %v301_v21  ;;  %318 = vst [vmem:[%s659_s2 + $0x48] sm:$0xff] %v302_v36 }
 0x166   :  { %v291_v18 = vpop.permute.xlu1 %290 }
 0x167   :  { %v307_v19 = vmul.f32 %v291_v18, %v427_v5  ;;  %v308_v34 = vmul.f32 %v291_v18, %v432_v6 }
 0x169   :  { %323 = vst [vmem:[%s659_s2 + $0x70] sm:$0xff] %v307_v19  ;;  %324 = vst [vmem:[%s659_s2 + $0x78] sm:$0xff] %v308_v34 }
 0x16a   :  { %329 = vsyncpa [#allocation3], 1 }

</bundles_post_ra>
